<compile_context>
chip_gen: v7x
topology: tpu7x:2x2x1
jax: 0.10.0
libtpu: 0.0.40
codegen_flags: <defaults>
</compile_context>

<pallas_src>
import functools

import numpy as np
import jax
import jax.numpy as jnp
from jax.experimental import pallas as pl
from jax.experimental.pallas import tpu as pltpu

PC_NON_MATCHING_SCORE_WEIGHT = 0.1
ADVERSARIAL_SCORE_WEIGHT = 0.001


# ----------------------------------------------------------------------------
# Pallas kernel
# ----------------------------------------------------------------------------
def _segment_score_kernel(qrep_ref, p_ref, inv_ref, emat_ref, out_ref, *,
                          ts, te):
    """Refs (per grid step (b, si, ei)):
       qrep_ref: (1, ts, te*L)  Q[b, s, :] tiled te times along lanes
       p_ref   : (1, 1, te*L)   flattened inclusive prefix sums P[e, l]
       inv_ref : (ts, te)       exact 1/(e-s+1), zero where e < s
       emat_ref: (te, te*L)     0/1 selector E[e, e*L + l] = 1 (lane expansion)
       out_ref : (1, ts, te*L)  score tile; flat lane axis = (end, label)
    """
    si = pl.program_id(1)
    ei = pl.program_id(2)

    # Whole tile strictly below the diagonal (every end < every start) -> 0.
    below_diag = (ei + 1) * te <= si * ts

    @pl.when(below_diag)
    def _zero():
        out_ref[...] = jnp.zeros_like(out_ref)

    @pl.when(jnp.logical_not(below_diag))
    def _compute():
        # Expand inv[s, e] -> inv[s, e*L + l] with one small MXU matmul; each
        # output element has exactly one non-zero contribution, so it is the
        # exact invlen value.  (Padded / e<s positions carry inv == 0.)
        inv_rep = jnp.dot(inv_ref[...], emat_ref[...],
                          preferred_element_type=jnp.float32)
        out_ref[0] = ((qrep_ref[0] + p_ref[0]) * inv_rep).astype(out_ref.dtype)


def _choose_tiles(t, nl, out_itemsize, ts_req=None, te_req=None):
    """Pick (padded T, start tile, end tile) and the double-buffered VMEM
    estimate.  te is 128 (lane-dense te*L stores) unless T itself is small."""
    if t <= 128 or t % 128 == 0:
        tp = t
    else:
        tp = ((t + 127) // 128) * 128
    te = te_req if te_req is not None else min(128, tp)
    ts = ts_req if ts_req is not None else min(128, tp)

    def est(ts_, te_):
        return 2 * (ts_ * te_ * nl * out_itemsize   # out tile
                    + ts_ * te_ * nl * 4            # q_rep tile
                    + te_ * te_ * nl * 4            # E selector
                    + ts_ * te_ * 4                 # invlen tile
                    + te_ * nl * 4)                 # P tile

    budget = 24 * 2 ** 20  # conservative: fits v5e's 16 MiB-default era too
    while est(ts, te) > budget and ts > 8 and tp % (ts // 2) == 0:
        ts //= 2
    return tp, ts, te, est(ts, te)


# ----------------------------------------------------------------------------
# Wrapper (mirrors the nn.Module)
# ----------------------------------------------------------------------------
class SegmentScorePallas:
    def __init__(self, with_attention, with_adversarial, batch_size,
                 sample_size, num_label, embedding_size,
                 out_dtype=jnp.float32, ts=None, te=None):
        if with_attention:
            # TODO(synk): with_attention=True path (ScaledDotProductAttention
            # + per-segment cosine similarity) not implemented in Pallas.
            raise NotImplementedError("with_attention=True not implemented")
        self.with_attention = with_attention
        self.with_adversarial = with_adversarial
        self.batch_size = batch_size
        self.sample_size = sample_size
        self.num_label = num_label
        self.embedding_size = embedding_size
        # out_dtype=jnp.bfloat16 halves the HBM writeback of the O(B*T^2*L)
        # output (the kernel keeps f32 math, casting only at the store).
        self.out_dtype = out_dtype
        self.ts = ts   # optional per-generation overrides (e.g. larger on v7x)
        self.te = te

    def __call__(self, active_frame_out, inactive_frame_out, harmony_pc_vector,
                 harmony_component_vector, harmony_components, PC_only):
        b, t, nl = self.batch_size, self.sample_size, self.num_label
        f32 = jnp.float32
        hi = jax.lax.Precision.HIGHEST

        # ---- fold every per-frame/per-label term into one (T,Ea)x(L,Ea) matmul
        a_pc = active_frame_out["pc"][:b].astype(f32)             # (B,T,Epc)
        h_pc = harmony_pc_vector[:b].astype(f32)                  # (B,L,Epc)

        x_parts, w_parts = [a_pc], []
        if self.with_adversarial:
            h_sum = jnp.sum(h_pc, axis=-1, keepdims=True)         # (B,L,1)
            # Guard against all-zero PC label rows (the PyTorch reference would
            # produce inf/nan there); documented behaviour difference.
            h_sum_safe = jnp.maximum(h_sum, 1e-12)
            # NB: the "inactive" 0.001 PC term uses active_pc in the source;
            # that exact behaviour is preserved by this folding.
            w_parts.append(1.2 * h_pc - PC_NON_MATCHING_SCORE_WEIGHT
                           - ADVERSARIAL_SCORE_WEIGHT * h_pc / h_sum_safe)
        else:
            w_parts.append(h_pc)

        comps = [] if PC_only else list(harmony_components)
        for i, c in enumerate(comps):
            a_c = active_frame_out[c][:b].astype(f32)
            h_c = harmony_component_vector[i][:b].astype(f32)
            x_parts.append(a_c)
            w_parts.append(h_c)
            if self.with_adversarial:
                i_c = inactive_frame_out[c][:b].astype(f32)
                x_parts.append(i_c)
                w_parts.append(-ADVERSARIAL_SCORE_WEIGHT * h_c)

        if self.with_adversarial:
            # constant-1 column carries the -0.1 * h_sum per-label bias
            x_parts.append(jnp.ones((b, t, 1), f32))
            w_parts.append(-PC_NON_MATCHING_SCORE_WEIGHT * h_sum)

        x = jnp.concatenate(x_parts, axis=-1)                     # (B,T,Ea)
        w = jnp.concatenate(w_parts, axis=-1)                     # (B,L,Ea)

        # ---- hoisted per-frame scores + prefix sums (plain XLA, once) -------
        g = jnp.einsum("bte,ble->btl", x, w, precision=hi)        # (B,T,L)
        p = jnp.cumsum(g, axis=1)                                 # inclusive
        q = g - p                                                 # Q[s]=G[s]-P[s]
        # score[b,s,e,l] = (Q[b,s,l] + P[b,e,l]) / (e-s+1)  for e >= s, else 0

        # ---- tiling / padding ------------------------------------------------
        out_itemsize = np.dtype(self.out_dtype).itemsize
        tp, ts, te, vmem_est = _choose_tiles(t, nl, out_itemsize,
                                             self.ts, self.te)
        if tp != t:
            pad = ((0, 0), (0, tp - t), (0, 0))
            q = jnp.pad(q, pad)
            p = jnp.pad(p, pad)

        # Q replicated te times along lanes: q_rep[b, s, e*L + l] = Q[b, s, l].
        q_rep = jnp.tile(q, (1, 1, te))                           # (B,Tp,te*L)
        p_flat = p.reshape(b, 1, tp * nl)                         # (B,1,Tp*L)

        # exact reciprocal segment-length table (zero above the diagonal e<s)
        s_idx = jnp.arange(tp, dtype=jnp.int32)[:, None]
        e_idx = jnp.arange(tp, dtype=jnp.int32)[None, :]
        seg_len = jnp.maximum(e_idx - s_idx + 1, 1).astype(f32)
        invlen = jnp.where(e_idx >= s_idx, 1.0 / seg_len, 0.0)    # (Tp,Tp)

        # 0/1 lane-expansion selector: E[e, e*L + l] = 1
        col_e = jnp.arange(te * nl, dtype=jnp.int32) // nl
        e_mat = (col_e[None, :] ==
                 jnp.arange(te, dtype=jnp.int32)[:, None]).astype(f32)

        grid = (b, tp // ts, tp // te)
        kernel = functools.partial(_segment_score_kernel, ts=ts, te=te)

        flops = (2 * b * tp * tp * nl                              # add + mul
                 + 2 * b * (tp // ts) * (tp // te) * ts * te * te * nl)  # inv@E
        bytes_accessed = (b * tp * tp * nl * out_itemsize
                          + 4 * (q_rep.size + p_flat.size
                                 + invlen.size + e_mat.size))
        vmem_limit = int(min(48 * 2 ** 20, max(32 * 2 ** 20, 2 * vmem_est)))

        out_flat = pl.pallas_call(
            kernel,
            out_shape=jax.ShapeDtypeStruct((b, tp, tp * nl), self.out_dtype),
            grid=grid,
            in_specs=[
                pl.BlockSpec((1, ts, te * nl), lambda bi, si, ei: (bi, si, 0)),
                pl.BlockSpec((1, 1, te * nl), lambda bi, si, ei: (bi, 0, ei)),
                pl.BlockSpec((ts, te), lambda bi, si, ei: (si, ei)),
                pl.BlockSpec((te, te * nl), lambda bi, si, ei: (0, 0)),
            ],
            out_specs=pl.BlockSpec((1, ts, te * nl),
                                   lambda bi, si, ei: (bi, si, ei)),
            compiler_params=pltpu.CompilerParams(
                dimension_semantics=("parallel", "parallel", "arbitrary"),
                vmem_limit_bytes=vmem_limit),
            cost_estimate=pl.CostEstimate(
                flops=int(flops), transcendentals=0,
                bytes_accessed=int(bytes_accessed)),
        )(q_rep, p_flat, invlen, e_mat)

        # Row-major (end, label) flattening == PyTorch (B, start, end, label):
        # this reshape is free (no data movement), unlike a transpose.
        out = out_flat.reshape(b, tp, tp, nl)
        if tp != t:
            out = out[:, :t, :t, :]
        return out


# ----------------------------------------------------------------------------
# Pure-JAX reference (mirrors the PyTorch nested-loop implementation)
# ----------------------------------------------------------------------------
def segment_score_ref(active_frame_out, inactive_frame_out, harmony_pc_vector,
                      harmony_component_vector, harmony_components, PC_only,
                      batch_size, sample_size, num_label, with_adversarial):
    hi = jax.lax.Precision.HIGHEST
    score = jnp.zeros((batch_size, sample_size, sample_size, num_label),
                      jnp.float32)
    a_pc = active_frame_out["pc"]
    h = harmony_pc_vector[:batch_size]
    for s in range(sample_size):
        for e in range(s, sample_size):
            seg = a_pc[:, s:e + 1, :]
            inact_seg = a_pc[:, s:e + 1, :]   # matches source: uses active_pc
            length = float(e - s + 1)
            avg = seg.sum(axis=1) / length
            val = jnp.einsum("ble,be->bl", h, avg, precision=hi)
            if with_adversarial:
                val = val - 0.1 * jnp.einsum("ble,be->bl", 1.0 - h, avg,
                                             precision=hi)
                avg_inv = (1.0 - seg).sum(axis=1) / length
                val = val - 0.1 * jnp.einsum("ble,be->bl", h, avg_inv,
                                             precision=hi)
                adv = (jnp.einsum("bte,ble->btl", inact_seg, h, precision=hi)
                       / h.sum(-1)[:, None, :])
                val = val - 0.001 * adv.sum(axis=1) / length
            if not PC_only:
                for i, c in enumerate(harmony_components):
                    a_c = active_frame_out[c][:, s:e + 1, :]
                    i_c = inactive_frame_out[c][:, s:e + 1, :]
                    hc = harmony_component_vector[i][:batch_size]
                    val = val + jnp.einsum("bte,ble->bl", a_c, hc,
                                           precision=hi) / length
                    if with_adversarial:
                        val = val - 0.001 * jnp.einsum("bte,ble->bl", i_c, hc,
                                                       precision=hi) / length
            score = score.at[:, s, e, :].add(val)
    return score


# ----------------------------------------------------------------------------
# Demo / test
# ----------------------------------------------------------------------------
if __name__ == "__main__":
    batch_size, sample_size, num_label = 2, 8, 16
    embedding_size = 12                       # 12 pitch classes
    harmony_components = ("root", "quality")
    component_dims = {"root": 12, "quality": 8}
    with_adversarial = True
    PC_only = False

    key = jax.random.PRNGKey(0)
    ks = jax.random.split(key, 9)

    def uni(k, shape):
        return jax.random.uniform(k, shape, dtype=jnp.float32)

    active_frame_out = {
        "pc": uni(ks[0], (batch_size, sample_size, embedding_size)),
        "root": uni(ks[1], (batch_size, sample_size, component_dims["root"])),
        "quality": uni(ks[2], (batch_size, sample_size, component_dims["quality"])),
    }
    inactive_frame_out = {
        "pc": uni(ks[3], (batch_size, sample_size, embedding_size)),
        "root": uni(ks[4], (batch_size, sample_size, component_dims["root"])),
        "quality": uni(ks[5], (batch_size, sample_size, component_dims["quality"])),
    }
    harmony_pc_vector = (uni(ks[6], (batch_size, num_label, embedding_size)) > 0.5
                         ).astype(jnp.float32)
    harmony_pc_vector = harmony_pc_vector.at[..., 0].set(1.0)  # avoid zero row-sums
    harmony_component_vector = [
        (uni(ks[7], (batch_size, num_label, component_dims["root"])) > 0.5
         ).astype(jnp.float32),
        (uni(ks[8], (batch_size, num_label, component_dims["quality"])) > 0.5
         ).astype(jnp.float32),
    ]

    model = SegmentScorePallas(
        with_attention=False, with_adversarial=with_adversarial,
        batch_size=batch_size, sample_size=sample_size,
        num_label=num_label, embedding_size=embedding_size)

    out = model(active_frame_out, inactive_frame_out, harmony_pc_vector,
                harmony_component_vector, harmony_components, PC_only)
    out = jax.block_until_ready(out)

    ref = segment_score_ref(active_frame_out, inactive_frame_out,
                            harmony_pc_vector, harmony_component_vector,
                            harmony_components, PC_only,
                            batch_size, sample_size, num_label,
                            with_adversarial)

    assert out.shape == (batch_size, sample_size, sample_size, num_label)
    assert out.dtype == jnp.float32
    if not bool(jnp.allclose(out, ref, rtol=2e-3, atol=2e-3)):
        max_err = float(jnp.max(jnp.abs(out - ref)))
        raise AssertionError(f"Pallas output mismatch, max_abs_err={max_err}")
    print("KERNEL_OK")
</pallas_src>

<mosaic_0001>
module attributes {stable_mosaic.version = 11 : i64} {
  func.func @_segment_score_kernel(%arg0: i32, %arg1: i32, %arg2: i32, %arg3: memref<1x8x128xf32, #tpu.memory_space<vmem>>, %arg4: memref<1x1x128xf32, #tpu.memory_space<vmem>>, %arg5: memref<8x8xf32, #tpu.memory_space<vmem>>, %arg6: memref<8x128xf32, #tpu.memory_space<vmem>>, %arg7: memref<1x8x128xf32, #tpu.memory_space<vmem>>) attributes {dimension_semantics = [#tpu.dimension_semantics<parallel>, #tpu.dimension_semantics<parallel>, #tpu.dimension_semantics<arbitrary>], iteration_bounds = array<i64: 2, 1, 1>, scalar_prefetch = 0 : i64, scratch_operands = 0 : i64, tpu.core_type = #tpu.core_type<tc>, window_params = [{transform_indices = @transform_0, window_bounds = array<i64: 1, 8, 128>}, {transform_indices = @transform_1, window_bounds = array<i64: 1, 1, 128>}, {transform_indices = @transform_2, window_bounds = array<i64: 8, 8>}, {pipeline_mode = #tpu.pipeline_mode<synchronous>, transform_indices = @transform_3, window_bounds = array<i64: 8, 128>}, {transform_indices = @transform_4, window_bounds = array<i64: 1, 8, 128>}]} {
    %c1_i32 = arith.constant 1 : i32
    %0 = arith.addi %arg2, %c1_i32 : i32
    %c8_i32 = arith.constant 8 : i32
    %1 = arith.muli %0, %c8_i32 : i32
    %c8_i32_0 = arith.constant 8 : i32
    %2 = arith.muli %arg1, %c8_i32_0 : i32
    %3 = arith.cmpi sle, %1, %2 : i32
    %4 = arith.extui %3 : i1 to i32
    %c0_i32 = arith.constant 0 : i32
    %5 = arith.cmpi ne, %4, %c0_i32 : i32
    scf.if %5 {
      %cst = arith.constant 0.000000e+00 : f32
      %9 = vector.broadcast %cst : f32 to vector<1x8x128xf32>
      %c0 = arith.constant 0 : index
      %c0_2 = arith.constant 0 : index
      %c0_3 = arith.constant 0 : index
      %10 = vector.load %arg7[%c0, %c0_2, %c0_3] : memref<1x8x128xf32, #tpu.memory_space<vmem>>, vector<1x8x128xf32>
      tpu.vector_store %arg7[%c0, %c0_2, %c0_3], %9 {strides = array<i32>} : memref<1x8x128xf32, #tpu.memory_space<vmem>>, vector<1x8x128xf32>,
    } else {
    }
    %true = arith.constant true
    %6 = arith.xori %3, %true : i1
    %7 = arith.extui %6 : i1 to i32
    %c0_i32_1 = arith.constant 0 : i32
    %8 = arith.cmpi ne, %7, %c0_i32_1 : i32
    scf.if %8 {
      %c0 = arith.constant 0 : index
      %c0_2 = arith.constant 0 : index
      %9 = vector.load %arg5[%c0, %c0_2] : memref<8x8xf32, #tpu.memory_space<vmem>>, vector<8x8xf32>
      %c0_3 = arith.constant 0 : index
      %c0_4 = arith.constant 0 : index
      %10 = vector.load %arg6[%c0_3, %c0_4] : memref<8x128xf32, #tpu.memory_space<vmem>>, vector<8x128xf32>
      %cst = arith.constant dense<0.000000e+00> : vector<8x128xf32>
      %11 = tpu.matmul %9, %10, %cst {dimension_numbers = #tpu.dot_dimension_numbers<[1], [0], [0], [1], [0, 0, 1, 1], [], []>} : vector<8x8xf32>, vector<8x128xf32>, vector<8x128xf32> -> vector<8x128xf32>
      %c0_5 = arith.constant 0 : index
      %c0_6 = arith.constant 0 : index
      %c0_7 = arith.constant 0 : index
      %12 = vector.load %arg3[%c0_5, %c0_6, %c0_7] : memref<1x8x128xf32, #tpu.memory_space<vmem>>, vector<1x8x128xf32>
      %13 = vector.shape_cast %12 : vector<1x8x128xf32> to vector<8x128xf32>
      %c0_8 = arith.constant 0 : index
      %c0_9 = arith.constant 0 : index
      %c0_10 = arith.constant 0 : index
      %14 = vector.load %arg4[%c0_8, %c0_9, %c0_10] : memref<1x1x128xf32, #tpu.memory_space<vmem>>, vector<1x1x128xf32>
      %15 = vector.shape_cast %14 : vector<1x1x128xf32> to vector<1x128xf32>
      %16 = vector.broadcast %15 : vector<1x128xf32> to vector<8x128xf32>
      %17 = arith.addf %13, %16 : vector<8x128xf32>
      %18 = arith.mulf %17, %11 : vector<8x128xf32>
      %c0_11 = arith.constant 0 : index
      %c0_12 = arith.constant 0 : index
      %c0_13 = arith.constant 0 : index
      %19 = vector.load %arg7[%c0_11, %c0_12, %c0_13] : memref<1x8x128xf32, #tpu.memory_space<vmem>>, vector<1x8x128xf32>
      %20 = vector.shape_cast %19 : vector<1x8x128xf32> to vector<8x128xf32>
      %21 = vector.shape_cast %18 : vector<8x128xf32> to vector<1x8x128xf32>
      tpu.vector_store %arg7[%c0_11, %c0_12, %c0_13], %21 {strides = array<i32>} : memref<1x8x128xf32, #tpu.memory_space<vmem>>, vector<1x8x128xf32>,
    } else {
    }
    return
  }
  func.func @transform_0(%arg0: i32, %arg1: i32, %arg2: i32) -> (i32, i32, i32) {
    %c0_i32 = arith.constant 0 : i32
    %c0_i32_0 = arith.constant 0 : i32
    return %arg0, %arg1, %c0_i32 : i32, i32, i32
  }
  func.func @transform_1(%arg0: i32, %arg1: i32, %arg2: i32) -> (i32, i32, i32) {
    %c0_i32 = arith.constant 0 : i32
    %c0_i32_0 = arith.constant 0 : i32
    return %arg0, %c0_i32, %arg2 : i32, i32, i32
  }
  func.func @transform_2(%arg0: i32, %arg1: i32, %arg2: i32) -> (i32, i32) {
    %c0_i32 = arith.constant 0 : i32
    return %arg1, %arg2 : i32, i32
  }
  func.func @transform_3(%arg0: i32, %arg1: i32, %arg2: i32) -> (i32, i32) {
    %c0_i32 = arith.constant 0 : i32
    %c0_i32_0 = arith.constant 0 : i32
    %c0_i32_1 = arith.constant 0 : i32
    return %c0_i32, %c0_i32_0 : i32, i32
  }
  func.func @transform_4(%arg0: i32, %arg1: i32, %arg2: i32) -> (i32, i32, i32) {
    %c0_i32 = arith.constant 0 : i32
    return %arg0, %arg1, %arg2 : i32, i32, i32
  }
}

</mosaic_0001>

<bundles_post_ra>
// kernel: tpu_custom_call.1
= control target key start
LH: loop header
LB: loop body
LE: loop exit
PB: predicated region body
PF: predicated region fallthrough
CT: control target
= control target key end

     0   :  { %9 = vsyncpa [#allocation3], 0  ;;  %s1010_s0 = inlined_call_operand.hbm [shape: f32[2,8,128], index: 0, kind: input, shape index: {}]   ;;  %s1011_s1 = inlined_call_operand.vmem [shape: f32[2,1,128], index: 1, kind: input, shape index: {}]   ;;  %s1012_s2 = inlined_call_operand.hbm [shape: f32[8,8], index: 2, kind: input, shape index: {}]   ;;  %s1013_s3 = inlined_call_operand.vmem [shape: f32[8,128], index: 3, kind: input, shape index: {}]   ;;  %s1014_s4 = inlined_call_operand.hbm [shape: f32[2,8,128], index: 4, kind: output, shape index: {}]  }
   0x1   :  { %11 = vsyncpa [#allocation3 + $0x1], 0 }
   0x2   :  { %12 = vsyncpa [#allocation6], 0 }
   0x3   :  { %13 = vsyncpa [#allocation4], 0 }
   0x4   :  { %15 = vsyncpa [#allocation4 + $0x1], 0  ;;  %s786_s15 = smov 0   ;;  %s788_s16 = smov 0  }
   0x5   :  { %s790_s17 = smov 0   ;;  %s792_s18 = smov 0  }
   0x6   :  { %s794_s19 = smov 0   ;;  %s796_s20 = smov 0  }
   0x7 LB: > { %s511_s21 = sadd.s32 4294967295, %s754_s20   ;;  %s512_s22 = sadd.s32 4294967294, %s754_s20   ;;  %s754_s20 = sphi %s796_s20, %s21_s20   ;;  %s750_s19 = sphi %s794_s19, %s1039_s19   ;;  %s746_s18 = sphi %s792_s18, %s1038_s18   ;;  %s742_s17 = sphi %s790_s17, %s1037_s17   ;;  %s738_s16 = sphi %s788_s16, %s1036_s16   ;;  %s734_s15 = sphi %s786_s15, %s1035_s15  }
   0x8   : > { %p62_p0 = scmp.ne.s32.totalorder %s738_s16, %s734_s15  ;;  %p820_p1 = scmp.eq.s32.totalorder %s511_s21, 0 }
   0x9   : > { %p824_p2 = scmp.eq.s32.totalorder %s511_s21, 1  ;;  %p173_p3 = scmp.eq.s32.totalorder %s512_s22, 1 }
   0xa   : > { %s1019_s23 = scalar_select %p820_p1, 1, 0 }
   0xb   : > { %s1020_s24 = scalar_select %p824_p2, 1, 0 }
   0xc   : > { %p830_p4 = por %p820_p1, %p62_p0  ;;  %p513_p5 = scmp.ge.s32.totalorder %s754_s20, 1 }
   0xd   : > { %p835_p6 = por %p173_p3, %p62_p0  ;;  %p180_p7 = scmp.lt.s32.totalorder %s754_s20, 3 }
   0xe   : > { %s1021_s25 = scalar_select %p830_p4, 1, 0 }
   0xf   : > { %s1022_s26 = scalar_select %p835_p6, 1, 0 }
  0x10   : > { %p840_p8 = pnand %p513_p5, %p180_p7  ;;  %s756_s28 = smov [#allocation5]  }
  0x11   : > { %s196_s29 = sshll.u32 %s756_s28, 4  ;;  %s40_s5 = sadd.s32 1, %s750_s19  ;;  %s197_s29 = int_to_ptr.vmem [resolvable:$true] %s196_s29 }
  0x12   : > { %s1023_s27 = scalar_select %p840_p8, 1, 0 }
  0x13   : > { %p543_p10 = pneg %p840_p8  ;;  %s49_s6 = sadd.s32 1, %s742_s17 }
  0x14   : > { %p855_p12 = scmp.ge.s32.totalorder %s40_s5, 2  ;;  %s610_s10 = scalar_lea.hbm %s1012_s2, 128 }
  0x15   : > { %p849_p11 = pnand %p543_p10, %p820_p1  ;;  %p611_p13 = scmp.ne.s32.totalorder %s1012_s2, %s610_s10 }
  0x16   : > { %s1025_s7 = scalar_select %p855_p12, 1, 0 }
  0x17   : > { %p612_p0 = pneg %p849_p11  ;;  %p617_p7 = scmp.lt.u32.totalorder %s610_s10, %s1012_s2 }
  0x19   : > { %p613_p3 = pnand %p612_p0, %p611_p13 }
  0x1b   : > { %p614_p5 = pneg %p613_p3 }
  0x1d   : > { %p619_p10 = pnand %p617_p7, %p614_p5 }
  0x1f   : > { %622 = shalt.err (!%p619_p10)
}
  0x20   : > { %s623_s21 = scalar_lea.vmem %s197_s29, 128  ;;  %p631_p4 = scmp.lt.s32.totalorder %s197_s29, %s197_s29 }
  0x21   : > { %p624_p9 = scmp.ne.s32.totalorder %s197_s29, %s623_s21  ;;  %p632_p8 = scmp.lt.s32.totalorder %s623_s21, %s623_s21 }
  0x23   : > { %p626_p6 = pnand %p624_p9, %p612_p0  ;;  %p633_p2 = por %p632_p8, %p631_p4 }
  0x25   : > { %p627_p1 = pneg %p626_p6 }
  0x27   : > { %p634_p12 = pnand %p633_p2, %p627_p1 }
  0x29   : > { %637 = shalt.err (!%p634_p12)
}
  0x2a   : > { %546 = dma.hbm_to_vmem [thread:$0]  (!%p849_p11), %s1012_s2, 128, %s197_s29, [#allocation6]  }
  0x2b   : > { %p1026_p4 = scmp.ne.s32.totalorder %s1025_s7, 0  ;;  %p56_p1 = scmp.ne.s32.totalorder %s742_s17, %s738_s16 }
  0x2c   : > { %p57_p2 = scmp.eq.s32.totalorder %s754_s20, 0  ;;  %p556_p6 = scmp.lt.s32.totalorder %s754_s20, 2 }
  0x2d   : > { %s1041_s5 = smov (%p1026_p4, %s40_s5), 0  ;;  %p1027_p12 = scmp.ne.s32.totalorder %s1020_s24, 0 }
  0x2e   : > { %s44_s30 = ssub.s32 %s750_s19, %s1041_s5  ;;  %p58_p9 = por %p57_p2, %p56_p1 }
  0x2f   : > { %p47_p8 = scmp.eq.s32.totalorder %s44_s30, 0  ;;  %p887_p13 = por %p1027_p12, %p56_p1 }
  0x30   : > { %s210_s9 = sand.u32 1, %s742_s17   ;;  %s517_s7 = sshll.u32 %s750_s19, 7 }
  0x31   : > { %s895_s10 = scalar_select %p47_p8, %s742_s17, %s49_s6  }
  0x32   : > { %s516_s29 = sshll.u32 %s210_s9, 3  ;;  %s901_s13 = scalar_lea.hbm %s1010_s0, %s517_s7 }
  0x33   : > { %s214_s24 = scalar_lea.vmem [#allocation2], %s516_s29  ;;  %p905_p11 = pnand %p556_p6, %p58_p9 }
  0x34   : > { %s222_s14 = sshll.u32 %s214_s24, 4  ;;  %s211_s6 = scalar_lea.sflag [#allocation3], %s210_s9  ;;  %s903_s14 = int_to_ptr.vmem [resolvable:$true] %s222_s14 }
  0x35   : > { %s638_s22 = scalar_lea.hbm %s901_s13, 128  ;;  %p640_p3 = pneg %p905_p11 }
  0x36   : > { %p639_p0 = scmp.ne.s32.totalorder %s901_s13, %s638_s22  ;;  %s643_s29 = scalar_lea.hbm %s1010_s0, 256 }
  0x37   : > { %p644_p10 = scmp.lt.u32.totalorder %s901_s13, %s1010_s0  ;;  %p645_p4 = scmp.lt.u32.totalorder %s643_s29, %s638_s22 }
  0x38   : > { %p641_p5 = pnand %p640_p3, %p639_p0  ;;  %p647_p2 = scmp.lt.u32.totalorder %s638_s22, %s901_s13 }
  0x39   : > { %p646_p1 = por %p645_p4, %p644_p10 }
  0x3a   : > { %p642_p7 = pneg %p641_p5 }
  0x3b   : > { %p648_p6 = por %p647_p2, %p646_p1 }
  0x3d   : > { %p649_p8 = pnand %p648_p6, %p642_p7 }
  0x3f   : > { %652 = shalt.err (!%p649_p8)
}
  0x40   : > { %s653_s9 = scalar_lea.vmem %s903_s14, 128  ;;  %s757_s12 = smov [#allocation2]  }
  0x41   : > { %p654_p9 = scmp.ne.s32.totalorder %s903_s14, %s653_s9  ;;  %s658_s24 = sshll.u32 %s757_s12, 4  ;;  %s659_s24 = int_to_ptr.vmem [resolvable:$false] %s658_s24 }
  0x42   : > { %s660_s28 = scalar_lea.vmem %s659_s24, 256  ;;  %p661_p5 = scmp.lt.s32.totalorder %s903_s14, %s659_s24 }
  0x43   : > { %p656_p12 = pnand %p654_p9, %p640_p3  ;;  %p662_p10 = scmp.lt.s32.totalorder %s660_s28, %s653_s9 }
  0x45   : > { %p657_p0 = pneg %p656_p12  ;;  %p663_p4 = por %p662_p10, %p661_p5 }
  0x47   : > { %p664_p1 = pnand %p663_p4, %p657_p0 }
  0x49   : > { %667 = shalt.err (!%p664_p1)
}
  0x4a   : > { %550 = dma.hbm_to_vmem [thread:$0]  (!%p905_p11), %s901_s13, 128, %s903_s14, %s211_s6  }
  0x4b   : > { %p1030_p7 = scmp.ne.s32.totalorder %s1023_s27, 0 }
  0x4c   : > { %s937_s22 = sand.u32 (!%p1030_p7), 1, %s738_s16   ;;  %p1031_p3 = scmp.ne.s32.totalorder (!%p1030_p7), %s1021_s25, 0 }
  0x4d   : > { %240 = sbr.rel (%p1030_p7) target bundleno = 319 (0x13f), region = 36  ;;  %s519_s30 = sshll.u32 (!%p1030_p7), %s937_s22, 3 }
  0x4e   : > { %s243_s29 = scalar_lea.sflag (!%p1030_p7), [#allocation3], %s937_s22  ;;  %s246_s7 = scalar_lea.vmem (!%p1030_p7), [#allocation2], %s519_s30 }
  0x54   : > { %721 = dma.done.wait (%p1031_p3), %s243_s29, 128  }
  0x55   : > { %723 = vsyncadd (%p1031_p3), %s243_s29, 4294967168  ;;  %p1032_p2 = scmp.ne.s32.totalorder %s1019_s23, 0 }
  0x57   : > { %725 = dma.done.wait (%p1032_p2), [#allocation6], 128  }
  0x58   : > { %727 = vsyncadd (%p1032_p2), [#allocation6], 4294967168  ;;  %v758_v0 = vmov 0.0   ;;  %vm759_vm0 = vmmov 0   ;;  %vm301_vm1 = vcmask 64512   ;;  %v300_v1 = vld [vmem:[%s1013_s3] sm:$0xff] }
  0x59   : > { %530 = vmatprep.subr.mxu0 %v758_v0  ;;  %532 = vmatprep.mubr.msk.f32.mxu0 %vm759_vm0, %v758_v0  ;;  %v299_v2 = vld [vmem:[#allocation5] sm:$0xff]  ;;  %p281_p11 = scmp.lt.s32.totalorder %s746_s18, 1  ;;  %v375_v3 = vld [vmem:[%s246_s7] sm:$0xff]  ;;  %s525_s6 = sshll.u32 %s746_s18, 7 }
  0x5a   : > { %531 = vmatpush3.msra.mxu0 %v300_v1  ;;  %s280_s11 = scalar_lea.vmem [#allocation7], %s519_s30  ;;  %s961_s28 = scalar_lea.hbm %s1014_s4, %s525_s6 }
  0x5b   : > { %533 = vmatmul.mubr.msk.f32.vlgmr.msra.gmra.mrb[0].mxu0 %vm301_vm1, %v299_v2  ;;  %s282_s25 = scalar_select %p281_p11, %s746_s18, 1 }
  0x5c   : > { %s402_s9 = sshll.u32 %s280_s11, 4  ;;  %s387_s29 = scalar_lea.sflag [#allocation4], %s937_s22  ;;  %s963_s9 = int_to_ptr.vmem [resolvable:$true] %s402_s9 }
  0x5d   : > { %s286_s21 = scalar_lea.vmem %s1011_s1, %s282_s25  ;;  %s668_s7 = scalar_lea.vmem %s963_s9, 128 }
  0x5e   : > { %v523_v4 = vld [vmem:[%s286_s21] ss:$0 sm:$0xff]  ;;  %p669_p6 = scmp.ne.s32.totalorder %s963_s9, %s668_s7  ;;  %s760_s18 = smov [#allocation7]  }
  0x5f   : > { %v383_v5 = vadd.f32 %v523_v4, %v375_v3  ;;  %s672_s30 = sshll.u32 %s760_s18, 4  ;;  %s673_s30 = int_to_ptr.vmem [resolvable:$false] %s672_s30 }
  0x60   : > { %p670_p8 = pnand %p669_p6, %p887_p13  ;;  %s674_s27 = scalar_lea.vmem %s673_s30, 256 }
  0x61   : > { %p675_p12 = scmp.lt.s32.totalorder %s963_s9, %s673_s30  ;;  %p676_p0 = scmp.lt.s32.totalorder %s674_s27, %s668_s7 }
  0x62   : > { %p671_p9 = pneg %p670_p8 }
  0x63   : > { %p677_p5 = por %p676_p0, %p675_p12 }
  0x65   : > { %p678_p10 = pnand %p677_p5, %p671_p9 }
 0x12e   : > { %v371_v6 = vpop.f32.mrb[0].mxu0 }
 0x12f   : > { %v384_v7 = vmul.f32 %v383_v5, %v371_v6  ;;  %v534_v8 = vpop.f32.mrb[1].mxu0 }
 0x131   : > { %385 = vst [vmem:[%s280_s11] sm:$0xff] %v384_v7 }
 0x132   : > { %681 = shalt.err (!%p678_p10)
}
 0x133   : > { %s682_s22 = scalar_lea.hbm %s961_s28, 128  ;;  %s686_s23 = scalar_lea.hbm %s1014_s4, 256 }
 0x134   : > { %p683_p4 = scmp.ne.s32.totalorder %s961_s28, %s682_s22  ;;  %p687_p3 = scmp.lt.u32.totalorder %s961_s28, %s1014_s4 }
 0x135   : > { %p688_p2 = scmp.lt.u32.totalorder %s686_s23, %s682_s22  ;;  %p690_p6 = scmp.lt.u32.totalorder %s682_s22, %s961_s28 }
 0x136   : > { %p684_p1 = pnand %p683_p4, %p887_p13 }
 0x137   : > { %p689_p11 = por %p688_p2, %p687_p3 }
 0x138   : > { %p685_p7 = pneg %p684_p1 }
 0x139   : > { %p691_p8 = por %p690_p6, %p689_p11 }
 0x13b   : > { %p692_p9 = pnand %p691_p8, %p685_p7 }
 0x13d   : > { %695 = shalt.err (!%p692_p9)
}
 0x13e   : > { %541 = dma.vmem_to_hbm [thread:$0]  (%p887_p13), %s963_s9, 128, %s961_s28, %s387_s29  }
 0x13f PF: > { %s414_s6 = sand.u32 1, %s734_s15   ;;  %p1033_p12 = scmp.ne.s32.totalorder %s1022_s26, 0 }
 0x140   : > { %p1034_p0 = scmp.ge.s32.totalorder %s754_s20, 2  ;;  %s415_s11 = scalar_lea.sflag [#allocation4], %s414_s6 }
 0x142   : > { %p552_p5 = pnand %p1034_p0, %p1033_p12 }
 0x144   : > { %729 = dma.done.wait (!%p552_p5), %s415_s11, 128  }
 0x145   : > { %731 = vsyncadd (!%p552_p5), %s415_s11, 4294967168  ;;  %s21_s20 = sadd.s32 1, %s754_s20   ;;  %s1035_s15 = smov %s738_s16 }
 0x146   : > { %p18_p10 = scmp.ge.s32.totalorder %s21_s20, 4   ;;  %s1036_s16 = smov %s742_s17 }
 0x147   : > { %s1037_s17 = smov %s895_s10  ;;  %s1038_s18 = smov %s750_s19 }
 0x148   : > { %s1039_s19 = smov %s1041_s5  ;;  %20 = sbr.rel (!%p18_p10) target bundleno = 7 (0x7), region = 97 }
 0x14f   :  { %420 = vsyncpa [#allocation3], 1 }
 0x150   :  { %422 = vsyncpa [#allocation3 + $0x1], 1 }
 0x151   :  { %423 = vsyncpa [#allocation6], 1 }
 0x152   :  { %424 = vsyncpa [#allocation4], 1 }
 0x153   :  { %426 = vsyncpa [#allocation4 + $0x1], 1 }

</bundles_post_ra>
